<compile_context>
chip_gen: v7x
topology: tpu7x:2x2x1
jax: 0.10.0
libtpu: 0.0.40
codegen_flags: <defaults>
</compile_context>

<pallas_src>
import jax
import jax.numpy as jnp
from jax.experimental import pallas as pl
from jax.experimental.pallas import tpu as pltpu


def rcb_kernel(xm_ref, xh0_ref, xh1_ref, w_ref, b_ref, o_ref):
    # xm_ref : (1, TH, Wp, C)  main rows of the zero-padded image (non-overlapping block)
    # xh0/1  : (1, 1,  Wp, C)  the two bottom halo rows -> overlapping window w/o HBM copy
    # w_ref  : (9, C, C)       BN-folded conv taps (kh*3+kw), each (C_in, C_out)
    # b_ref  : (1, C)          fused bias = (conv_bias - mean)*scale + beta   (f32)
    # o_ref  : (1, TH, W, C)
    TH = xm_ref.shape[1]
    Wp = xm_ref.shape[2]
    C = xm_ref.shape[3]
    W = o_ref.shape[2]

    # Assemble the (TH+2, Wp, C) window and ReLU in the native dtype
    # (relu(0) = 0, so the zero padding is unaffected).
    xw = jnp.maximum(
        jnp.concatenate([xm_ref[0], xh0_ref[0], xh1_ref[0]], axis=0), 0)
    # Layout-preserving flatten: Wp % 8 == 0, so sublane tiling is unchanged.
    xf = xw.reshape((TH + 2) * Wp, C)
    n = TH * Wp

    # One running f32 accumulator; every per-tap LHS slice starts at a multiple of Wp
    # (aligned sublane start -> no relayout copy), and the W shift per kw is an XLU roll.
    out = None
    for kw in range(3):
        acc = jnp.zeros((n, C), dtype=jnp.float32)
        for kh in range(3):
            lhs = xf[kh * Wp:(kh + TH) * Wp]                  # sublane-aligned static slice
            acc = acc + jnp.dot(lhs, w_ref[kh * 3 + kw],
                                preferred_element_type=jnp.float32)
        acc = acc.reshape(TH, Wp, C)
        if kw:
            # roll by -kw along W: exact because wrapped columns land in cols >= W
            # (Wp >= W + 2), which are discarded below.  XLU slot is idle here.
            acc = pltpu.roll(acc, shift=Wp - kw, axis=1)
        out = acc if out is None else out + acc

    out = out[:, :W, :] + b_ref[0]                            # fused conv-bias + BN shift
    o_ref[0] = out.astype(o_ref.dtype)


def _pick_tile_h(H, W, C, itemsize, batch, vmem_budget_bytes, max_rows=512,
                 min_grid_steps=4):
    """Largest divisor of H whose per-step working set fits the VMEM budget, preferring
    enough grid steps (batch * H/TH >= min_grid_steps) so both v7x TensorCores stay busy."""
    Wp = ((W + 2) + 7) // 8 * 8

    def est(th):
        blk_in = 2 * (th + 2) * Wp * C * itemsize      # main + 2 halo rows, double-buffered
        blk_out = 2 * th * W * C * itemsize            # output block, double-buffered
        weights = 2 * 9 * C * C * itemsize + 2 * C * 4  # folded taps + fused bias
        window = (th + 2) * Wp * C * itemsize          # ReLU'd window temporary
        f32_live = 2 * th * Wp * C * 4                 # running out + current per-kw acc
        epilogue = th * W * C * 4                      # sliced f32 result before cast
        return blk_in + blk_out + weights + window + f32_live + epilogue

    fits = [th for th in range(1, min(H, max_rows) + 1)
            if H % th == 0 and est(th) <= vmem_budget_bytes]
    if not fits:
        return 1
    preferred = [th for th in fits if batch * (H // th) >= min_grid_steps]
    return max(preferred) if preferred else max(fits)


def rcb_forward(x_nchw, w_oihw, bias, gamma, beta, running_mean, running_var,
                eps=1e-5, tile_h=None, mxu_dtype=None,
                vmem_limit_bytes=48 << 20, vmem_budget_bytes=None):
    """RCB forward: BatchNorm(Conv3x3(ReLU(x))), eval-mode BN. Input/output NCHW.

    mxu_dtype: optionally feed the MXU in a narrower dtype (e.g. jnp.bfloat16) when the
    model runs f32 on v5e/v6e — ~2x MXU throughput and half the activation/weight DMA
    bytes; accumulation stays f32 (expect bf16-level input precision).
    """
    B, C, H, W = x_nchw.shape
    assert w_oihw.shape == (C, C, 3, 3), "RCB uses a square 3x3 conv (C_in == C_out)"

    out_dtype = x_nchw.dtype
    compute_dtype = jnp.dtype(mxu_dtype) if mxu_dtype is not None else jnp.dtype(out_dtype)
    isz = compute_dtype.itemsize

    # Fold BN (eval) + conv bias into the weights / one fused bias (fold in f32, cast last):
    #   y = conv_{w*scale}(relu(x)) + (bias - mean)*scale + beta
    scale = (gamma / jnp.sqrt(running_var + eps)).astype(jnp.float32)   # (C,) per out-channel
    w_folded = w_oihw.astype(jnp.float32) * scale[:, None, None, None]  # (O, I, 3, 3)
    b_fused = ((bias - running_mean) * scale + beta).astype(jnp.float32)
    # Per-tap (C_in, C_out) slabs in the MXU dtype.
    w_taps = jnp.transpose(w_folded, (2, 3, 1, 0)).reshape(9, C, C).astype(compute_dtype)

    Wp = ((W + 2) + 7) // 8 * 8                     # sublane-aligned padded width (>= W + 2)
    if vmem_budget_bytes is None:
        vmem_budget_bytes = int(vmem_limit_bytes * 0.6)
    if tile_h is None:
        tile_h = _pick_tile_h(H, W, C, isz, B, vmem_budget_bytes)
    TH = tile_h
    assert H % TH == 0, "tile_h must divide H"
    nH = H // TH

    # Single prep pass over the activations: NCHW->NHWC, zero-pad H by (1,1) and W to Wp,
    # optional downcast — XLA fuses these into one copy.  The overlapping halo is NOT
    # materialized in HBM anymore; it is fetched per tile by the halo BlockSpecs below.
    # TODO(synk): if the surrounding graph is already NHWC, drop both transposes entirely.
    x = jnp.transpose(x_nchw, (0, 2, 3, 1)).astype(compute_dtype)       # NCHW -> NHWC
    x_pad = jnp.pad(x, ((0, 0), (1, 1), (1, Wp - W - 1), (0, 0)))       # (B, H+2, Wp, C)

    out_nhwc = pl.pallas_call(
        rcb_kernel,
        out_shape=jax.ShapeDtypeStruct((B, H, W, C), out_dtype),
        grid_spec=pltpu.PrefetchScalarGridSpec(
            num_scalar_prefetch=0,
            grid=(B, nH),
            in_specs=[
                # Main TH rows of the padded image (standard non-overlapping tiling).
                pl.BlockSpec((1, TH, Wp, C), lambda b, h: (b, h, 0, 0)),
                # Two 1-row bottom-halo blocks of the SAME array -> overlapping window.
                pl.BlockSpec((1, 1, Wp, C), lambda b, h: (b, (h + 1) * TH, 0, 0)),
                pl.BlockSpec((1, 1, Wp, C), lambda b, h: (b, (h + 1) * TH + 1, 0, 0)),
                # Resident folded weights + fused bias (constant index map -> fetched once).
                pl.BlockSpec((9, C, C), lambda b, h: (0, 0, 0)),
                pl.BlockSpec((1, C), lambda b, h: (0, 0)),
            ],
            out_specs=pl.BlockSpec((1, TH, W, C), lambda b, h: (b, h, 0, 0)),
        ),
        compiler_params=pltpu.CompilerParams(
            dimension_semantics=("parallel", "parallel"),
            vmem_limit_bytes=vmem_limit_bytes),
    )(x_pad, x_pad, x_pad, w_taps, b_fused.reshape(1, C))

    return jnp.transpose(out_nhwc, (0, 3, 1, 2))                        # NHWC -> NCHW


def _reference(x_nchw, w_oihw, bias, gamma, beta, mean, var, eps=1e-5):
    """Pure-JAX reference: BN(Conv3x3(ReLU(x)))."""
    xr = jnp.maximum(x_nchw, 0.0)
    y = jax.lax.conv_general_dilated(
        xr, w_oihw, window_strides=(1, 1), padding=((1, 1), (1, 1)),
        dimension_numbers=("NCHW", "OIHW", "NCHW"))
    y = y + bias[None, :, None, None]
    scale = gamma / jnp.sqrt(var + eps)
    shift = beta - mean * scale
    return y * scale[None, :, None, None] + shift[None, :, None, None]


if __name__ == "__main__":
    B, C, H, W = 2, 4, 16, 16
    key = jax.random.PRNGKey(0)
    kx, kw_, kb, kg, kbeta, kmean, kvar = jax.random.split(key, 7)

    x = jax.random.normal(kx, (B, C, H, W), dtype=jnp.float32)

    # Conv2d(C, C, 3, padding=1, bias=True) parameters (c2_xavier_fill ~ scaled normal here).
    fan_in = C * 3 * 3
    w = jax.random.normal(kw_, (C, C, 3, 3), dtype=jnp.float32) * (1.0 / fan_in) ** 0.5
    bias = jax.random.normal(kb, (C,), dtype=jnp.float32) * 0.1

    # BatchNorm(C) parameters (eval mode: running stats).
    gamma = 1.0 + 0.1 * jax.random.normal(kg, (C,), dtype=jnp.float32)
    beta = 0.1 * jax.random.normal(kbeta, (C,), dtype=jnp.float32)
    running_mean = 0.1 * jax.random.normal(kmean, (C,), dtype=jnp.float32)
    running_var = jnp.abs(jax.random.normal(kvar, (C,), dtype=jnp.float32)) + 0.5

    ref = _reference(x, w, bias, gamma, beta, running_mean, running_var)

    # Multi-tile path: grid = (2, 2), exercises the 2-row BlockSpec halo and the roll epilogue.
    out = rcb_forward(x, w, bias, gamma, beta, running_mean, running_var, tile_h=8)
    out = jax.block_until_ready(out)
    assert out.shape == (B, C, H, W)
    assert jnp.allclose(out, ref, atol=1e-4, rtol=1e-4), "mismatch vs reference (tiled)"

    # Single tile per image: halo rows are the bottom zero-pad rows.
    out2 = rcb_forward(x, w, bias, gamma, beta, running_mean, running_var, tile_h=16)
    out2 = jax.block_until_ready(out2)
    assert jnp.allclose(out2, ref, atol=1e-4, rtol=1e-4), "mismatch vs reference (single tile)"

    # Default tile picker (chooses TH=8 here so batch*nH >= 4 grid steps).
    out3 = rcb_forward(x, w, bias, gamma, beta, running_mean, running_var)
    out3 = jax.block_until_ready(out3)
    assert jnp.allclose(out3, ref, atol=1e-4, rtol=1e-4), "mismatch vs reference (default)"

    print("KERNEL_OK")
</pallas_src>

<mosaic_0001>
module attributes {stable_mosaic.version = 11 : i64} {
  func.func @rcb_kernel(%arg0: i32, %arg1: i32, %arg2: memref<1x8x24x4xf32, #tpu.memory_space<vmem>>, %arg3: memref<1x1x24x4xf32, #tpu.memory_space<vmem>>, %arg4: memref<1x1x24x4xf32, #tpu.memory_space<vmem>>, %arg5: memref<9x4x4xf32, #tpu.memory_space<vmem>>, %arg6: memref<1x4xf32, #tpu.memory_space<vmem>>, %arg7: memref<1x8x16x4xf32, #tpu.memory_space<vmem>>) attributes {dimension_semantics = [#tpu.dimension_semantics<parallel>, #tpu.dimension_semantics<parallel>], iteration_bounds = array<i64: 2, 2>, scalar_prefetch = 0 : i64, scratch_operands = 0 : i64, tpu.core_type = #tpu.core_type<tc>, window_params = [{transform_indices = @transform_0, window_bounds = array<i64: 1, 8, 24, 4>}, {transform_indices = @transform_1, window_bounds = array<i64: 1, 1, 24, 4>}, {transform_indices = @transform_2, window_bounds = array<i64: 1, 1, 24, 4>}, {pipeline_mode = #tpu.pipeline_mode<synchronous>, transform_indices = @transform_3, window_bounds = array<i64: 9, 4, 4>}, {pipeline_mode = #tpu.pipeline_mode<synchronous>, transform_indices = @transform_4, window_bounds = array<i64: 1, 4>}, {transform_indices = @transform_5, window_bounds = array<i64: 1, 8, 16, 4>}]} {
    %c0 = arith.constant 0 : index
    %c0_0 = arith.constant 0 : index
    %c0_1 = arith.constant 0 : index
    %c0_2 = arith.constant 0 : index
    %0 = vector.load %arg2[%c0, %c0_0, %c0_1, %c0_2] : memref<1x8x24x4xf32, #tpu.memory_space<vmem>>, vector<1x8x24x4xf32>
    %1 = vector.shape_cast %0 : vector<1x8x24x4xf32> to vector<8x24x4xf32>
    %c0_3 = arith.constant 0 : index
    %c0_4 = arith.constant 0 : index
    %c0_5 = arith.constant 0 : index
    %c0_6 = arith.constant 0 : index
    %2 = vector.load %arg3[%c0_3, %c0_4, %c0_5, %c0_6] : memref<1x1x24x4xf32, #tpu.memory_space<vmem>>, vector<1x1x24x4xf32>
    %3 = vector.shape_cast %2 : vector<1x1x24x4xf32> to vector<1x24x4xf32>
    %c0_7 = arith.constant 0 : index
    %c0_8 = arith.constant 0 : index
    %c0_9 = arith.constant 0 : index
    %c0_10 = arith.constant 0 : index
    %4 = vector.load %arg4[%c0_7, %c0_8, %c0_9, %c0_10] : memref<1x1x24x4xf32, #tpu.memory_space<vmem>>, vector<1x1x24x4xf32>
    %5 = vector.shape_cast %4 : vector<1x1x24x4xf32> to vector<1x24x4xf32>
    %6 = tpu.concatenate %1, %3, %5 in 0 : vector<8x24x4xf32>, vector<1x24x4xf32>, vector<1x24x4xf32> -> vector<10x24x4xf32>
    %cst = arith.constant 0.000000e+00 : f32
    %7 = vector.broadcast %cst : f32 to vector<10x24x4xf32>
    %8 = arith.maximumf %6, %7 : vector<10x24x4xf32>
    %9 = vector.shape_cast %8 : vector<10x24x4xf32> to vector<240x4xf32>
    %cst_11 = arith.constant 0.000000e+00 : f32
    %10 = vector.broadcast %cst_11 : f32 to vector<192x4xf32>
    %11 = vector.extract_strided_slice %9 {offsets = [0, 0], sizes = [192, 4], strides = [1, 1]} : vector<240x4xf32> to vector<192x4xf32>
    %c0_12 = arith.constant 0 : index
    %c0_13 = arith.constant 0 : index
    %c0_14 = arith.constant 0 : index
    %12 = vector.load %arg5[%c0_12, %c0_13, %c0_14] : memref<9x4x4xf32, #tpu.memory_space<vmem>>, vector<1x4x4xf32>
    %13 = vector.shape_cast %12 : vector<1x4x4xf32> to vector<4x4xf32>
    %cst_15 = arith.constant dense<0.000000e+00> : vector<192x4xf32>
    %14 = tpu.matmul %11, %13, %cst_15 {dimension_numbers = #tpu.dot_dimension_numbers<[1], [0], [0], [1], [0, 0, 1, 1], [], []>} : vector<192x4xf32>, vector<4x4xf32>, vector<192x4xf32> -> vector<192x4xf32>
    %15 = arith.addf %10, %14 : vector<192x4xf32>
    %16 = vector.extract_strided_slice %9 {offsets = [24, 0], sizes = [192, 4], strides = [1, 1]} : vector<240x4xf32> to vector<192x4xf32>
    %c3 = arith.constant 3 : index
    %c0_16 = arith.constant 0 : index
    %c0_17 = arith.constant 0 : index
    %17 = vector.load %arg5[%c3, %c0_16, %c0_17] : memref<9x4x4xf32, #tpu.memory_space<vmem>>, vector<1x4x4xf32>
    %18 = vector.shape_cast %17 : vector<1x4x4xf32> to vector<4x4xf32>
    %cst_18 = arith.constant dense<0.000000e+00> : vector<192x4xf32>
    %19 = tpu.matmul %16, %18, %cst_18 {dimension_numbers = #tpu.dot_dimension_numbers<[1], [0], [0], [1], [0, 0, 1, 1], [], []>} : vector<192x4xf32>, vector<4x4xf32>, vector<192x4xf32> -> vector<192x4xf32>
    %20 = arith.addf %15, %19 : vector<192x4xf32>
    %21 = vector.extract_strided_slice %9 {offsets = [48, 0], sizes = [192, 4], strides = [1, 1]} : vector<240x4xf32> to vector<192x4xf32>
    %c6 = arith.constant 6 : index
    %c0_19 = arith.constant 0 : index
    %c0_20 = arith.constant 0 : index
    %22 = vector.load %arg5[%c6, %c0_19, %c0_20] : memref<9x4x4xf32, #tpu.memory_space<vmem>>, vector<1x4x4xf32>
    %23 = vector.shape_cast %22 : vector<1x4x4xf32> to vector<4x4xf32>
    %cst_21 = arith.constant dense<0.000000e+00> : vector<192x4xf32>
    %24 = tpu.matmul %21, %23, %cst_21 {dimension_numbers = #tpu.dot_dimension_numbers<[1], [0], [0], [1], [0, 0, 1, 1], [], []>} : vector<192x4xf32>, vector<4x4xf32>, vector<192x4xf32> -> vector<192x4xf32>
    %25 = arith.addf %20, %24 : vector<192x4xf32>
    %26 = vector.shape_cast %25 : vector<192x4xf32> to vector<8x24x4xf32>
    %cst_22 = arith.constant 0.000000e+00 : f32
    %27 = vector.broadcast %cst_22 : f32 to vector<192x4xf32>
    %28 = vector.extract_strided_slice %9 {offsets = [0, 0], sizes = [192, 4], strides = [1, 1]} : vector<240x4xf32> to vector<192x4xf32>
    %c1 = arith.constant 1 : index
    %c0_23 = arith.constant 0 : index
    %c0_24 = arith.constant 0 : index
    %29 = vector.load %arg5[%c1, %c0_23, %c0_24] : memref<9x4x4xf32, #tpu.memory_space<vmem>>, vector<1x4x4xf32>
    %30 = vector.shape_cast %29 : vector<1x4x4xf32> to vector<4x4xf32>
    %cst_25 = arith.constant dense<0.000000e+00> : vector<192x4xf32>
    %31 = tpu.matmul %28, %30, %cst_25 {dimension_numbers = #tpu.dot_dimension_numbers<[1], [0], [0], [1], [0, 0, 1, 1], [], []>} : vector<192x4xf32>, vector<4x4xf32>, vector<192x4xf32> -> vector<192x4xf32>
    %32 = arith.addf %27, %31 : vector<192x4xf32>
    %33 = vector.extract_strided_slice %9 {offsets = [24, 0], sizes = [192, 4], strides = [1, 1]} : vector<240x4xf32> to vector<192x4xf32>
    %c4 = arith.constant 4 : index
    %c0_26 = arith.constant 0 : index
    %c0_27 = arith.constant 0 : index
    %34 = vector.load %arg5[%c4, %c0_26, %c0_27] : memref<9x4x4xf32, #tpu.memory_space<vmem>>, vector<1x4x4xf32>
    %35 = vector.shape_cast %34 : vector<1x4x4xf32> to vector<4x4xf32>
    %cst_28 = arith.constant dense<0.000000e+00> : vector<192x4xf32>
    %36 = tpu.matmul %33, %35, %cst_28 {dimension_numbers = #tpu.dot_dimension_numbers<[1], [0], [0], [1], [0, 0, 1, 1], [], []>} : vector<192x4xf32>, vector<4x4xf32>, vector<192x4xf32> -> vector<192x4xf32>
    %37 = arith.addf %32, %36 : vector<192x4xf32>
    %38 = vector.extract_strided_slice %9 {offsets = [48, 0], sizes = [192, 4], strides = [1, 1]} : vector<240x4xf32> to vector<192x4xf32>
    %c7 = arith.constant 7 : index
    %c0_29 = arith.constant 0 : index
    %c0_30 = arith.constant 0 : index
    %39 = vector.load %arg5[%c7, %c0_29, %c0_30] : memref<9x4x4xf32, #tpu.memory_space<vmem>>, vector<1x4x4xf32>
    %40 = vector.shape_cast %39 : vector<1x4x4xf32> to vector<4x4xf32>
    %cst_31 = arith.constant dense<0.000000e+00> : vector<192x4xf32>
    %41 = tpu.matmul %38, %40, %cst_31 {dimension_numbers = #tpu.dot_dimension_numbers<[1], [0], [0], [1], [0, 0, 1, 1], [], []>} : vector<192x4xf32>, vector<4x4xf32>, vector<192x4xf32> -> vector<192x4xf32>
    %42 = arith.addf %37, %41 : vector<192x4xf32>
    %43 = vector.shape_cast %42 : vector<192x4xf32> to vector<8x24x4xf32>
    %c23_i32 = arith.constant 23 : i32
    %44 = tpu.dynamic_rotate %43 by %c23_i32 dim 1 : vector<8x24x4xf32>, i32 -> vector<8x24x4xf32>
    %45 = arith.addf %26, %44 : vector<8x24x4xf32>
    %cst_32 = arith.constant 0.000000e+00 : f32
    %46 = vector.broadcast %cst_32 : f32 to vector<192x4xf32>
    %47 = vector.extract_strided_slice %9 {offsets = [0, 0], sizes = [192, 4], strides = [1, 1]} : vector<240x4xf32> to vector<192x4xf32>
    %c2 = arith.constant 2 : index
    %c0_33 = arith.constant 0 : index
    %c0_34 = arith.constant 0 : index
    %48 = vector.load %arg5[%c2, %c0_33, %c0_34] : memref<9x4x4xf32, #tpu.memory_space<vmem>>, vector<1x4x4xf32>
    %49 = vector.shape_cast %48 : vector<1x4x4xf32> to vector<4x4xf32>
    %cst_35 = arith.constant dense<0.000000e+00> : vector<192x4xf32>
    %50 = tpu.matmul %47, %49, %cst_35 {dimension_numbers = #tpu.dot_dimension_numbers<[1], [0], [0], [1], [0, 0, 1, 1], [], []>} : vector<192x4xf32>, vector<4x4xf32>, vector<192x4xf32> -> vector<192x4xf32>
    %51 = arith.addf %46, %50 : vector<192x4xf32>
    %52 = vector.extract_strided_slice %9 {offsets = [24, 0], sizes = [192, 4], strides = [1, 1]} : vector<240x4xf32> to vector<192x4xf32>
    %c5 = arith.constant 5 : index
    %c0_36 = arith.constant 0 : index
    %c0_37 = arith.constant 0 : index
    %53 = vector.load %arg5[%c5, %c0_36, %c0_37] : memref<9x4x4xf32, #tpu.memory_space<vmem>>, vector<1x4x4xf32>
    %54 = vector.shape_cast %53 : vector<1x4x4xf32> to vector<4x4xf32>
    %cst_38 = arith.constant dense<0.000000e+00> : vector<192x4xf32>
    %55 = tpu.matmul %52, %54, %cst_38 {dimension_numbers = #tpu.dot_dimension_numbers<[1], [0], [0], [1], [0, 0, 1, 1], [], []>} : vector<192x4xf32>, vector<4x4xf32>, vector<192x4xf32> -> vector<192x4xf32>
    %56 = arith.addf %51, %55 : vector<192x4xf32>
    %57 = vector.extract_strided_slice %9 {offsets = [48, 0], sizes = [192, 4], strides = [1, 1]} : vector<240x4xf32> to vector<192x4xf32>
    %c8 = arith.constant 8 : index
    %c0_39 = arith.constant 0 : index
    %c0_40 = arith.constant 0 : index
    %58 = vector.load %arg5[%c8, %c0_39, %c0_40] : memref<9x4x4xf32, #tpu.memory_space<vmem>>, vector<1x4x4xf32>
    %59 = vector.shape_cast %58 : vector<1x4x4xf32> to vector<4x4xf32>
    %cst_41 = arith.constant dense<0.000000e+00> : vector<192x4xf32>
    %60 = tpu.matmul %57, %59, %cst_41 {dimension_numbers = #tpu.dot_dimension_numbers<[1], [0], [0], [1], [0, 0, 1, 1], [], []>} : vector<192x4xf32>, vector<4x4xf32>, vector<192x4xf32> -> vector<192x4xf32>
    %61 = arith.addf %56, %60 : vector<192x4xf32>
    %62 = vector.shape_cast %61 : vector<192x4xf32> to vector<8x24x4xf32>
    %c22_i32 = arith.constant 22 : i32
    %63 = tpu.dynamic_rotate %62 by %c22_i32 dim 1 : vector<8x24x4xf32>, i32 -> vector<8x24x4xf32>
    %64 = arith.addf %45, %63 : vector<8x24x4xf32>
    %65 = vector.extract_strided_slice %64 {offsets = [0, 0, 0], sizes = [8, 16, 4], strides = [1, 1, 1]} : vector<8x24x4xf32> to vector<8x16x4xf32>
    %c0_42 = arith.constant 0 : index
    %c0_43 = arith.constant 0 : index
    %66 = vector.load %arg6[%c0_42, %c0_43] : memref<1x4xf32, #tpu.memory_space<vmem>>, vector<1x4xf32>
    %67 = vector.shape_cast %66 : vector<1x4xf32> to vector<4xf32>
    %68 = vector.shape_cast %67 : vector<4xf32> to vector<1x1x4xf32>
    %69 = vector.broadcast %68 : vector<1x1x4xf32> to vector<8x16x4xf32>
    %70 = arith.addf %65, %69 : vector<8x16x4xf32>
    %c0_44 = arith.constant 0 : index
    %c0_45 = arith.constant 0 : index
    %c0_46 = arith.constant 0 : index
    %c0_47 = arith.constant 0 : index
    %71 = vector.load %arg7[%c0_44, %c0_45, %c0_46, %c0_47] : memref<1x8x16x4xf32, #tpu.memory_space<vmem>>, vector<1x8x16x4xf32>
    %72 = vector.shape_cast %71 : vector<1x8x16x4xf32> to vector<8x16x4xf32>
    %73 = vector.shape_cast %70 : vector<8x16x4xf32> to vector<1x8x16x4xf32>
    tpu.vector_store %arg7[%c0_44, %c0_45, %c0_46, %c0_47], %73 {strides = array<i32>} : memref<1x8x16x4xf32, #tpu.memory_space<vmem>>, vector<1x8x16x4xf32>,
    return
  }
  func.func @transform_0(%arg0: i32, %arg1: i32) -> (i32, i32, i32, i32) {
    %c0_i32 = arith.constant 0 : i32
    %c0_i32_0 = arith.constant 0 : i32
    %c0_i32_1 = arith.constant 0 : i32
    return %arg0, %arg1, %c0_i32, %c0_i32_0 : i32, i32, i32, i32
  }
  func.func @transform_1(%arg0: i32, %arg1: i32) -> (i32, i32, i32, i32) {
    %c1_i32 = arith.constant 1 : i32
    %0 = arith.addi %arg1, %c1_i32 : i32
    %c8_i32 = arith.constant 8 : i32
    %1 = arith.muli %0, %c8_i32 : i32
    %c0_i32 = arith.constant 0 : i32
    %c0_i32_0 = arith.constant 0 : i32
    %c0_i32_1 = arith.constant 0 : i32
    return %arg0, %1, %c0_i32, %c0_i32_0 : i32, i32, i32, i32
  }
  func.func @transform_2(%arg0: i32, %arg1: i32) -> (i32, i32, i32, i32) {
    %c1_i32 = arith.constant 1 : i32
    %0 = arith.addi %arg1, %c1_i32 : i32
    %c8_i32 = arith.constant 8 : i32
    %1 = arith.muli %0, %c8_i32 : i32
    %c1_i32_0 = arith.constant 1 : i32
    %2 = arith.addi %1, %c1_i32_0 : i32
    %c0_i32 = arith.constant 0 : i32
    %c0_i32_1 = arith.constant 0 : i32
    %c0_i32_2 = arith.constant 0 : i32
    return %arg0, %2, %c0_i32, %c0_i32_1 : i32, i32, i32, i32
  }
  func.func @transform_3(%arg0: i32, %arg1: i32) -> (i32, i32, i32) {
    %c0_i32 = arith.constant 0 : i32
    %c0_i32_0 = arith.constant 0 : i32
    %c0_i32_1 = arith.constant 0 : i32
    %c0_i32_2 = arith.constant 0 : i32
    return %c0_i32, %c0_i32_0, %c0_i32_1 : i32, i32, i32
  }
  func.func @transform_4(%arg0: i32, %arg1: i32) -> (i32, i32) {
    %c0_i32 = arith.constant 0 : i32
    %c0_i32_0 = arith.constant 0 : i32
    %c0_i32_1 = arith.constant 0 : i32
    return %c0_i32, %c0_i32_0 : i32, i32
  }
  func.func @transform_5(%arg0: i32, %arg1: i32) -> (i32, i32, i32, i32) {
    %c0_i32 = arith.constant 0 : i32
    %c0_i32_0 = arith.constant 0 : i32
    %c0_i32_1 = arith.constant 0 : i32
    return %arg0, %arg1, %c0_i32, %c0_i32_0 : i32, i32, i32, i32
  }
}

</mosaic_0001>

<bundles_post_ra>
// kernel: tpu_custom_call.1
= control target key start
LH: loop header
LB: loop body
LE: loop exit
PB: predicated region body
PF: predicated region fallthrough
CT: control target
= control target key end

     0   :  { %s3656_s18 = smov 0   ;;  %s3658_s19 = smov 0   ;;  %s4478_s0 = inlined_call_operand.vmem [shape: f32[2,18,24,4], index: 0, kind: input, shape index: {}]   ;;  %s4479_s1 = inlined_call_operand.vmem [shape: f32[2,18,24,4], index: 1, kind: input, shape index: {}]   ;;  %s4480_s2 = inlined_call_operand.vmem [shape: f32[2,18,24,4], index: 2, kind: input, shape index: {}]   ;;  %s4481_s3 = inlined_call_operand.vmem [shape: f32[9,4,4], index: 3, kind: input, shape index: {}]   ;;  %s4482_s4 = inlined_call_operand.vmem [shape: f32[1,4], index: 4, kind: input, shape index: {}]   ;;  %s4483_s5 = inlined_call_operand.vmem [shape: f32[2,16,16,4], index: 5, kind: output, shape index: {}]  }
   0x1   :  { %s3660_s20 = smov 0   ;;  %s3662_s21 = smov 0  }
   0x2   :  { %s3664_s22 = smov 0  }
   0x3 LB: > { %s24_s23 = sadd.s32 1, %s3616_s20  ;;  %s27_s24 = sadd.s32 1, %s3620_s21  ;;  %s3624_s22 = sphi %s3664_s22, %s15_s22   ;;  %s3620_s21 = sphi %s3662_s21, %s4487_s21   ;;  %s3616_s20 = sphi %s3660_s20, %s4486_s20   ;;  %s3612_s19 = sphi %s3658_s19, %s4485_s19   ;;  %s3608_s18 = sphi %s3656_s18, %s4484_s18  }
   0x4   : > { %p25_p0 = scmp.ge.s32.totalorder %s24_s23, 2  ;;  %p2602_p1 = scmp.ge.s32.totalorder %s3624_s22, 1 }
   0x5   : > { %p271_p2 = scmp.lt.s32.totalorder %s3624_s22, 5 }
   0x6   : > { %s4489_s23 = smov (%p25_p0, %s24_s23), 0  ;;  %s4491_s24 = smov (!%p25_p0, %s27_s24), %s3620_s21 }
   0x7   : > { %p272_p3 = pnand %p2602_p1, %p271_p2  ;;  %p29_p4 = scmp.ge.s32.totalorder %s4491_s24, 2 }
   0x8   : > { %v2613_v0 = vld [vmem:[%s4481_s3 + $0xc] sm:$0xf] (!%p272_p3)  ;;  %vm533_vm0 = vcmask (!%p272_p3), 1043456   ;;  %v457_v1 = vld [vmem:[%s4481_s3] sm:$0xf] (!%p272_p3)  ;;  %s3692_s29 = sshll.u32 (!%p272_p3), %s3608_s18, 3 }
   0x9   : > { %s4493_s24 = smov (%p29_p4, %s4491_s24), 0  ;;  %275 = sbr.rel (%p272_p3) target bundleno = 463 (0x1cf), region = 40 }
   0xa   : > { %3086 = vmatprep.subr.msk.mxu1 (!%p272_p3), %vm533_vm0, %v2613_v0  ;;  %3124 = vmatprep.subr.msk.mxu0 (!%p272_p3), %vm533_vm0, %v457_v1  ;;  %p343_p5 = scmp.lt.s32.totalorder (!%p272_p3), %s3612_s19, 1  ;;  %p345_p6 = scmp.lt.s32.totalorder (!%p272_p3), %s3692_s29, 17  ;;  %v2664_v2 = vld [vmem:[%s4481_s3 + $0x18] sm:$0xf] (!%p272_p3)  ;;  %vm460_vm1 = vcmask (!%p272_p3), 31744  }
   0xb   : > { %3087 = vmatpush3.msk.msra.mxu1 (!%p272_p3), %vm533_vm0, %v2613_v0  ;;  %3125 = vmatpush3.msk.msra.mxu0 (!%p272_p3), %vm533_vm0, %v457_v1  ;;  %v2769_v18 = vld [vmem:[%s4481_s3 + $0x14] sm:$0xf] (!%p272_p3)  ;;  %v3752_v19 = vld [vmem:[%s4481_s3 + $0x10] sm:$0xf] (!%p272_p3)  ;;  %s3795_s25 = sadd.s32 (!%p272_p3), 8, %s3692_s29  ;;  %p389_p9 = scmp.lt.s32.totalorder (!%p272_p3), %s3692_s29, 15 }
   0xc   : > { %3428 = vmatprep.subr.msk.mxu1 (!%p272_p3), %vm533_vm0, %v457_v1  ;;  %3162 = vmatprep.subr.msk.mxu0 (!%p272_p3), %vm533_vm0, %v2664_v2  ;;  %p362_p7 = scmp.lt.s32.totalorder (!%p272_p3), %s3795_s25, 17  ;;  %v3845_v43 = vld [vmem:[%s4481_s3 + $0x8] sm:$0xf] (!%p272_p3)  ;;  %s373_s12 = sadd.s32 (!%p272_p3), 1, %s3795_s25  ;;  %v2690_v60 = vld [vmem:[%s4481_s3 + $0x4] sm:$0xf] (!%p272_p3) }
   0xd   : > { %p376_p8 = scmp.lt.s32.totalorder (!%p272_p3), %s373_s12, 17 }
  0x10   : > { %s4495_s19 = smov (!%p343_p5, %s3612_s19), 1  ;;  %s4497_s12 = smov (!%p376_p8, %s373_s12), 17 }
  0x11   : > { %s346_s7 = scalar_select %p345_p6, %s3692_s29, 17 }
  0x12   : > { %s3708_s8 = smul.u32 54, %s4495_s19  ;;  %s4499_s29 = smov (!%p389_p9, %s3692_s29), 15 }
  0x13   : > { %s3542_s9 = smul.u32 3, %s346_s7 }
  0x14   : > { %s363_s26 = scalar_select %p362_p7, %s3795_s25, 17 }
  0x15   : > { %s349_s10 = sadd.s32 %s3708_s8, %s3542_s9  ;;  %s3545_s13 = smul.u32 3, %s4497_s12 }
  0x16   : > { %s2604_s11 = sshll.u32 %s349_s10, 3  ;;  %s3544_s27 = smul.u32 3, %s363_s26 }
  0x17   : > { %s3714_s14 = scalar_lea.vmem %s4478_s0, %s2604_s11  ;;  %s380_s16 = sadd.s32 %s3545_s13, %s3708_s8 }
  0x18   : > { %v400_v3 = vld [vmem:[%s3714_s14 + $0x18] sm:$0xff]  ;;  %v397_v4 = vld [vmem:[%s3714_s14] sm:$0xff]  ;;  %v398_v9 = vld [vmem:[%s3714_s14 + $0x8] sm:$0xff]  ;;  %s366_s6 = sadd.s32 %s3544_s27, %s3708_s8  ;;  %s2608_s17 = sshll.u32 %s380_s16, 3 }
  0x19   : > { %v401_v5 = vld [vmem:[%s3714_s14 + $0x20] sm:$0xff]  ;;  %v3719_v6 = vmax.f32 %v400_v3, 0.0  ;;  %v3721_v7 = vmax.f32 %v397_v4, 0.0  ;;  %v402_v10 = vld [vmem:[%s3714_s14 + $0x28] sm:$0xff]  ;;  %v399_v11 = vld [vmem:[%s3714_s14 + $0x10] sm:$0xff]  ;;  %v3728_v12 = vmax.f32 %v398_v9, 0.0  ;;  %s382_s25 = scalar_lea.vmem %s4480_s2, %s2608_s17 }
  0x1a   : > { %v3723_v8 = vmax.f32 %v401_v5, 0.0  ;;  %v3730_v13 = vmax.f32 %v402_v10, 0.0  ;;  %v3732_v14 = vmax.f32 %v399_v11, 0.0  ;;  %v403_v15 = vld [vmem:[%s3714_s14 + $0x30] sm:$0xff]  ;;  %v404_v16 = vld [vmem:[%s3714_s14 + $0x38] sm:$0xff]  ;;  %v405_v21 = vld [vmem:[%s3714_s14 + $0x40] sm:$0xff] }
  0x1b   : > { %3088 = vmatprep.mubr.msk.f32.mxu1 %vm460_vm1, %v3719_v6  ;;  %3126 = vmatprep.mubr.msk.f32.mxu0 %vm460_vm1, %v3721_v7  ;;  %v3744_v17 = vmax.f32 %v403_v15, 0.0  ;;  %v3756_v20 = vmax.f32 %v404_v16, 0.0  ;;  %v406_v22 = vld [vmem:[%s3714_s14 + $0x48] sm:$0xff]  ;;  %v3771_v23 = vmax.f32 %v405_v21, 0.0  ;;  %v407_v25 = vld [vmem:[%s3714_s14 + $0x50] sm:$0xff]  ;;  %v408_v26 = vld [vmem:[%s3714_s14 + $0x58] sm:$0xff] }
  0x1c   : > { %3089 = vmatmul.mubr.msk.f32.vlgmr.msra.gmra.mrb[0].mxu1 %vm460_vm1, %v3723_v8  ;;  %3127 = vmatmul.mubr.msk.f32.vlgmr.msra.gmra.mrb[0].mxu0 %vm460_vm1, %v3728_v12  ;;  %v3777_v24 = vmax.f32 %v406_v22, 0.0  ;;  %v3785_v27 = vmax.f32 %v407_v25, 0.0  ;;  %v3791_v28 = vmax.f32 %v408_v26, 0.0  ;;  %v409_v29 = vld [vmem:[%s3714_s14 + $0x60] sm:$0xff]  ;;  %v410_v30 = vld [vmem:[%s3714_s14 + $0x68] sm:$0xff]  ;;  %v411_v33 = vld [vmem:[%s3714_s14 + $0x70] sm:$0xff] }
  0x1d   : > { %3429 = vmatpush3.msk.msra.mxu1 %vm533_vm0, %v457_v1  ;;  %3163 = vmatpush3.msk.msra.mxu0 %vm533_vm0, %v2664_v2  ;;  %v3802_v31 = vmax.f32 %v409_v29, 0.0  ;;  %v3809_v32 = vmax.f32 %v410_v30, 0.0  ;;  %v412_v34 = vld [vmem:[%s3714_s14 + $0x78] sm:$0xff]  ;;  %v3817_v35 = vmax.f32 %v411_v33, 0.0  ;;  %v413_v37 = vld [vmem:[%s3714_s14 + $0x80] sm:$0xff]  ;;  %v414_v38 = vld [vmem:[%s3714_s14 + $0x88] sm:$0xff] }
  0x1e   : > { %3091 = vmatprep.mubr.msk.f32.mxu1 %vm460_vm1, %v3730_v13  ;;  %3129 = vmatprep.mubr.msk.f32.mxu0 %vm460_vm1, %v3732_v14  ;;  %v3824_v36 = vmax.f32 %v412_v34, 0.0  ;;  %v3832_v39 = vmax.f32 %v413_v37, 0.0  ;;  %v3838_v40 = vmax.f32 %v414_v38, 0.0  ;;  %v415_v41 = vld [vmem:[%s3714_s14 + $0x90] sm:$0xff]  ;;  %v416_v42 = vld [vmem:[%s3714_s14 + $0x98] sm:$0xff]  ;;  %v417_v46 = vld [vmem:[%s3714_s14 + $0xa0] sm:$0xff] }
  0x1f   : > { %3314 = vmatprep.subr.msk.mxu0 %vm533_vm0, %v2769_v18  ;;  %3200 = vmatprep.subr.msk.mxu1 %vm533_vm0, %v3752_v19  ;;  %v3851_v44 = vmax.f32 %v415_v41, 0.0  ;;  %v3857_v45 = vmax.f32 %v416_v42, 0.0  ;;  %v418_v47 = vld [vmem:[%s3714_s14 + $0xa8] sm:$0xff]  ;;  %s2606_s7 = sshll.u32 %s366_s6, 3  ;;  %v3869_v48 = vmax.f32 %v417_v46, 0.0  ;;  %v419_v50 = vld [vmem:[%s3714_s14 + $0xb0] sm:$0xff] }
  0x20   : > { %3092 = vmatmul.mubr.msk.f32.gmra.mrb[2].mxu1 %vm460_vm1, %v3744_v17  ;;  %3130 = vmatmul.mubr.msk.f32.gmra.mrb[2].mxu0 %vm460_vm1, %v3719_v6  ;;  %v3875_v49 = vmax.f32 %v418_v47, 0.0  ;;  %v420_v51 = vld [vmem:[%s3714_s14 + $0xb8] sm:$0xff]  ;;  %s368_s11 = scalar_lea.vmem %s4479_s1, %s2606_s7  ;;  %v3886_v52 = vmax.f32 %v419_v50, 0.0  ;;  %v424_v61 = vld [vmem:[%s382_s25] sm:$0xff]  ;;  %v425_v62 = vld [vmem:[%s382_s25 + $0x8] sm:$0xff]  ;;  %s2610_s6 = sshll.u32 %s4499_s29, 1 }
  0x21   : > { %3094 = vmatprep.mubr.msk.f32.mxu1 %vm460_vm1, %v3756_v20  ;;  %3132 = vmatprep.mubr.msk.f32.mxu0 %vm460_vm1, %v3723_v8  ;;  %v3892_v53 = vmax.f32 %v420_v51, 0.0  ;;  %v421_v54 = vld [vmem:[%s368_s11] sm:$0xff]  ;;  %v422_v55 = vld [vmem:[%s368_s11 + $0x8] sm:$0xff]  ;;  %v423_v58 = vld [vmem:[%s368_s11 + $0x10] sm:$0xff]  ;;  %v3963_v63 = vmax.f32 %v424_v61, 0.0  ;;  %v3969_v0 = vmax.f32 %v425_v62, 0.0 }
  0x22   : > { %v3899_v56 = vmax.f32 %v421_v54, 0.0  ;;  %v3905_v57 = vmax.f32 %v422_v55, 0.0  ;;  %v3911_v59 = vmax.f32 %v423_v58, 0.0  ;;  %v426_v1 = vld [vmem:[%s382_s25 + $0x10] sm:$0xff]  ;;  %v2742_v3 = vld [vmem:[%s4481_s3 + $0x1c] sm:$0xf] }
  0x23   : > { %v3975_v2 = vmax.f32 %v426_v1, 0.0  ;;  %v2820_v4 = vld [vmem:[%s4481_s3 + $0x20] sm:$0xf]  ;;  %s2611_s7 = sshll.u32 %s4495_s19, 5 }
  0x24   : > { %3095 = vmatmul.mubr.msk.f32.gmra.mrb[4].mxu1 %vm460_vm1, %v3771_v23  ;;  %3133 = vmatmul.mubr.msk.f32.gmra.mrb[4].mxu0 %vm460_vm1, %v3730_v13  ;;  %s393_s9 = sadd.s32 %s2611_s7, %s2610_s6 }
  0x25   : > { %3097 = vmatprep.mubr.msk.f32.mxu1 %vm460_vm1, %v3777_v24  ;;  %3135 = vmatprep.mubr.msk.f32.mxu0 %vm460_vm1, %v3744_v17  ;;  %s2612_s19 = sshll.u32 %s393_s9, 3 }
  0x26   : > { %s4338_s13 = scalar_lea.vmem %s4483_s5, %s2612_s19 }
  0x28   : > { %3098 = vmatmul.mubr.msk.f32.gmra.mrb[6].mxu1 %vm460_vm1, %v3785_v27  ;;  %3136 = vmatmul.mubr.msk.f32.gmra.mrb[6].mxu0 %vm460_vm1, %v3756_v20 }
  0x29   : > { %3100 = vmatprep.mubr.msk.f32.mxu1 %vm460_vm1, %v3791_v28  ;;  %3138 = vmatprep.mubr.msk.f32.mxu0 %vm460_vm1, %v3771_v23 }
  0x2c   : > { %3101 = vmatmul.mubr.msk.f32.gmra.mrb[8].mxu1 %vm460_vm1, %v3802_v31  ;;  %3139 = vmatmul.mubr.msk.f32.gmra.mrb[8].mxu0 %vm460_vm1, %v3777_v24 }
  0x2d   : > { %3103 = vmatprep.mubr.msk.f32.mxu1 %vm460_vm1, %v3809_v32  ;;  %3141 = vmatprep.mubr.msk.f32.mxu0 %vm460_vm1, %v3785_v27 }
  0x30   : > { %3104 = vmatmul.mubr.msk.f32.gmra.mrb[10].mxu1 %vm460_vm1, %v3817_v35  ;;  %3142 = vmatmul.mubr.msk.f32.gmra.mrb[10].mxu0 %vm460_vm1, %v3791_v28 }
  0x31   : > { %3106 = vmatprep.mubr.msk.f32.mxu1 %vm460_vm1, %v3824_v36  ;;  %3164 = vmatprep.mubr.msk.f32.mxu0 %vm460_vm1, %v3744_v17 }
  0x34   : > { %3107 = vmatmul.mubr.msk.f32.gmra.mrb[12].mxu1 %vm460_vm1, %v3832_v39  ;;  %3165 = vmatmul.mubr.msk.f32.vlgmr.msra.gmra.mrb[0].mxu0 %vm460_vm1, %v3756_v20 }
  0x35   : > { %3315 = vmatpush3.msk.msra.mxu0 %vm533_vm0, %v2769_v18  ;;  %3109 = vmatprep.mubr.msk.f32.mxu1 %vm460_vm1, %v3838_v40 }
  0x36   : > { %3167 = vmatprep.mubr.msk.f32.mxu0 %vm460_vm1, %v3771_v23  ;;  %3352 = vmatprep.subr.msk.mxu0 %vm533_vm0, %v3845_v43 }
  0x38   : > { %3110 = vmatmul.mubr.msk.f32.gmra.mrb[14].mxu1 %vm460_vm1, %v3851_v44  ;;  %3168 = vmatmul.mubr.msk.f32.gmra.mrb[12].mxu0 %vm460_vm1, %v3777_v24 }
  0x39   : > { %3112 = vmatprep.mubr.msk.f32.mxu1 %vm460_vm1, %v3857_v45  ;;  %3170 = vmatprep.mubr.msk.f32.mxu0 %vm460_vm1, %v3785_v27 }
  0x3c   : > { %3113 = vmatmul.mubr.msk.f32.gmra.mrb[16].mxu1 %vm460_vm1, %v3869_v48  ;;  %3171 = vmatmul.mubr.msk.f32.gmra.mrb[14].mxu0 %vm460_vm1, %v3791_v28 }
  0x3d   : > { %3115 = vmatprep.mubr.msk.f32.mxu1 %vm460_vm1, %v3875_v49  ;;  %3173 = vmatprep.mubr.msk.f32.mxu0 %vm460_vm1, %v3802_v31 }
  0x40   : > { %3116 = vmatmul.mubr.msk.f32.gmra.mrb[18].mxu1 %vm460_vm1, %v3886_v52  ;;  %3174 = vmatmul.mubr.msk.f32.gmra.mrb[6].mxu0 %vm460_vm1, %v3809_v32 }
  0x41   : > { %3118 = vmatprep.mubr.msk.f32.mxu1 %vm460_vm1, %v3892_v53  ;;  %3176 = vmatprep.mubr.msk.f32.mxu0 %vm460_vm1, %v3817_v35 }
  0x44   : > { %3119 = vmatmul.mubr.msk.f32.gmra.mrb[20].mxu1 %vm460_vm1, %v3899_v56  ;;  %3177 = vmatmul.mubr.msk.f32.gmra.mrb[16].mxu0 %vm460_vm1, %v3824_v36 }
  0x45   : > { %3121 = vmatprep.mubr.msk.f32.mxu1 %vm460_vm1, %v3905_v57  ;;  %3179 = vmatprep.mubr.msk.f32.mxu0 %vm460_vm1, %v3832_v39 }
  0x48   : > { %3122 = vmatmul.mubr.msk.f32.gmra.mrb[22].mxu1 %vm460_vm1, %v3911_v59  ;;  %3180 = vmatmul.mubr.msk.f32.gmra.mrb[18].mxu0 %vm460_vm1, %v3838_v40 }
  0x49   : > { %3144 = vmatprep.mubr.msk.f32.mxu1 %vm460_vm1, %v3802_v31  ;;  %3182 = vmatprep.mubr.msk.f32.mxu0 %vm460_vm1, %v3851_v44 }
  0x4c   : > { %3145 = vmatmul.mubr.msk.f32.vlgmr.msra.gmra.mrb[12].mxu1 %vm460_vm1, %v3809_v32  ;;  %3183 = vmatmul.mubr.msk.f32.gmra.mrb[20].mxu0 %vm460_vm1, %v3857_v45 }
  0x4d   : > { %3201 = vmatpush3.msk.msra.mxu1 %vm533_vm0, %v3752_v19  ;;  %3147 = vmatprep.mubr.msk.f32.mxu1 %vm460_vm1, %v3817_v35 }
  0x4e   : > { %3185 = vmatprep.mubr.msk.f32.mxu0 %vm460_vm1, %v3869_v48  ;;  %3238 = vmatprep.subr.msk.mxu1 %vm533_vm0, %v2690_v60 }
  0x50   : > { %3148 = vmatmul.mubr.msk.f32.gmra.mrb[24].mxu1 %vm460_vm1, %v3824_v36  ;;  %3186 = vmatmul.mubr.msk.f32.gmra.mrb[22].mxu0 %vm460_vm1, %v3875_v49 }
  0x51   : > { %3150 = vmatprep.mubr.msk.f32.mxu1 %vm460_vm1, %v3832_v39  ;;  %3188 = vmatprep.mubr.msk.f32.mxu0 %vm460_vm1, %v3886_v52 }
  0x54   : > { %3151 = vmatmul.mubr.msk.f32.gmra.mrb[26].mxu1 %vm460_vm1, %v3838_v40  ;;  %3189 = vmatmul.mubr.msk.f32.gmra.mrb[24].mxu0 %vm460_vm1, %v3892_v53 }
  0x55   : > { %3153 = vmatprep.mubr.msk.f32.mxu1 %vm460_vm1, %v3851_v44  ;;  %3191 = vmatprep.mubr.msk.f32.mxu0 %vm460_vm1, %v3899_v56 }
  0x58   : > { %3154 = vmatmul.mubr.msk.f32.gmra.mrb[18].mxu1 %vm460_vm1, %v3857_v45  ;;  %3192 = vmatmul.mubr.msk.f32.gmra.mrb[26].mxu0 %vm460_vm1, %v3905_v57 }
  0x59   : > { %3156 = vmatprep.mubr.msk.f32.mxu1 %vm460_vm1, %v3869_v48  ;;  %3194 = vmatprep.mubr.msk.f32.mxu0 %vm460_vm1, %v3911_v59 }
  0x5c   : > { %3157 = vmatmul.mubr.msk.f32.gmra.mrb[28].mxu1 %vm460_vm1, %v3875_v49  ;;  %3195 = vmatmul.mubr.msk.f32.gmra.mrb[28].mxu0 %vm460_vm1, %v3963_v63 }
  0x5d   : > { %3159 = vmatprep.mubr.msk.f32.mxu1 %vm460_vm1, %v3886_v52  ;;  %3197 = vmatprep.mubr.msk.f32.mxu0 %vm460_vm1, %v3969_v0 }
  0x60   : > { %3160 = vmatmul.mubr.msk.f32.gmra.mrb[30].mxu1 %vm460_vm1, %v3892_v53  ;;  %3198 = vmatmul.mubr.msk.f32.gmra.mrb[30].mxu0 %vm460_vm1, %v3975_v2 }
  0x61   : > { %3202 = vmatprep.mubr.msk.f32.mxu1 %vm460_vm1, %v3719_v6  ;;  %3316 = vmatprep.mubr.msk.f32.mxu0 %vm460_vm1, %v3719_v6 }
  0x64   : > { %3203 = vmatmul.mubr.msk.f32.vlgmr.msra.gmra.mrb[32].mxu1 %vm460_vm1, %v3723_v8  ;;  %3317 = vmatmul.mubr.msk.f32.vlgmr.msra.gmra.mrb[32].mxu0 %vm460_vm1, %v3723_v8 }
  0x65   : > { %3239 = vmatpush3.msk.msra.mxu1 %vm533_vm0, %v2690_v60  ;;  %3353 = vmatpush3.msk.msra.mxu0 %vm533_vm0, %v3845_v43 }
  0x66   : > { %3205 = vmatprep.mubr.msk.f32.mxu1 %vm460_vm1, %v3730_v13  ;;  %3319 = vmatprep.mubr.msk.f32.mxu0 %vm460_vm1, %v3730_v13 }
  0x67   : > { %3276 = vmatprep.subr.msk.mxu1 %vm533_vm0, %v2742_v3  ;;  %3390 = vmatprep.subr.msk.mxu0 %vm533_vm0, %v2820_v4 }
  0x68   : > { %3206 = vmatmul.mubr.msk.f32.gmra.mrb[34].mxu1 %vm460_vm1, %v3744_v17  ;;  %3320 = vmatmul.mubr.msk.f32.gmra.mrb[34].mxu0 %vm460_vm1, %v3744_v17 }
  0x69   : > { %3208 = vmatprep.mubr.msk.f32.mxu1 %vm460_vm1, %v3756_v20  ;;  %3322 = vmatprep.mubr.msk.f32.mxu0 %vm460_vm1, %v3756_v20 }
  0x6c   : > { %3209 = vmatmul.mubr.msk.f32.gmra.mrb[36].mxu1 %vm460_vm1, %v3771_v23  ;;  %3323 = vmatmul.mubr.msk.f32.gmra.mrb[36].mxu0 %vm460_vm1, %v3771_v23 }
  0x6d   : > { %3211 = vmatprep.mubr.msk.f32.mxu1 %vm460_vm1, %v3777_v24  ;;  %3325 = vmatprep.mubr.msk.f32.mxu0 %vm460_vm1, %v3777_v24 }
  0x70   : > { %3212 = vmatmul.mubr.msk.f32.gmra.mrb[38].mxu1 %vm460_vm1, %v3785_v27  ;;  %3326 = vmatmul.mubr.msk.f32.gmra.mrb[38].mxu0 %vm460_vm1, %v3785_v27 }
  0x71   : > { %3214 = vmatprep.mubr.msk.f32.mxu1 %vm460_vm1, %v3791_v28  ;;  %3328 = vmatprep.mubr.msk.f32.mxu0 %vm460_vm1, %v3791_v28 }
  0x74   : > { %3215 = vmatmul.mubr.msk.f32.gmra.mrb[40].mxu1 %vm460_vm1, %v3802_v31  ;;  %3329 = vmatmul.mubr.msk.f32.gmra.mrb[40].mxu0 %vm460_vm1, %v3802_v31 }
  0x75   : > { %3217 = vmatprep.mubr.msk.f32.mxu1 %vm460_vm1, %v3809_v32  ;;  %3331 = vmatprep.mubr.msk.f32.mxu0 %vm460_vm1, %v3809_v32 }
  0x78   : > { %3218 = vmatmul.mubr.msk.f32.gmra.mrb[42].mxu1 %vm460_vm1, %v3817_v35  ;;  %3332 = vmatmul.mubr.msk.f32.gmra.mrb[42].mxu0 %vm460_vm1, %v3817_v35 }
  0x79   : > { %3220 = vmatprep.mubr.msk.f32.mxu1 %vm460_vm1, %v3824_v36  ;;  %3334 = vmatprep.mubr.msk.f32.mxu0 %vm460_vm1, %v3824_v36 }
  0x7c   : > { %3221 = vmatmul.mubr.msk.f32.gmra.mrb[44].mxu1 %vm460_vm1, %v3832_v39  ;;  %3335 = vmatmul.mubr.msk.f32.gmra.mrb[44].mxu0 %vm460_vm1, %v3832_v39 }
  0x7d   : > { %3223 = vmatprep.mubr.msk.f32.mxu1 %vm460_vm1, %v3838_v40  ;;  %3337 = vmatprep.mubr.msk.f32.mxu0 %vm460_vm1, %v3838_v40 }
  0x80   : > { %3224 = vmatmul.mubr.msk.f32.gmra.mrb[46].mxu1 %vm460_vm1, %v3851_v44  ;;  %3338 = vmatmul.mubr.msk.f32.gmra.mrb[46].mxu0 %vm460_vm1, %v3851_v44 }
  0x81   : > { %3226 = vmatprep.mubr.msk.f32.mxu1 %vm460_vm1, %v3857_v45  ;;  %3340 = vmatprep.mubr.msk.f32.mxu0 %vm460_vm1, %v3857_v45 }
  0x84   : > { %3227 = vmatmul.mubr.msk.f32.gmra.mrb[48].mxu1 %vm460_vm1, %v3869_v48  ;;  %3341 = vmatmul.mubr.msk.f32.gmra.mrb[48].mxu0 %vm460_vm1, %v3869_v48 }
  0x85   : > { %3229 = vmatprep.mubr.msk.f32.mxu1 %vm460_vm1, %v3875_v49  ;;  %3343 = vmatprep.mubr.msk.f32.mxu0 %vm460_vm1, %v3875_v49 }
  0x88   : > { %3230 = vmatmul.mubr.msk.f32.gmra.mrb[50].mxu1 %vm460_vm1, %v3886_v52  ;;  %3344 = vmatmul.mubr.msk.f32.gmra.mrb[50].mxu0 %vm460_vm1, %v3886_v52 }
  0x89   : > { %3232 = vmatprep.mubr.msk.f32.mxu1 %vm460_vm1, %v3892_v53  ;;  %3346 = vmatprep.mubr.msk.f32.mxu0 %vm460_vm1, %v3892_v53 }
  0x8c   : > { %3233 = vmatmul.mubr.msk.f32.gmra.mrb[52].mxu1 %vm460_vm1, %v3899_v56  ;;  %3347 = vmatmul.mubr.msk.f32.gmra.mrb[52].mxu0 %vm460_vm1, %v3899_v56 }
  0x8d   : > { %3235 = vmatprep.mubr.msk.f32.mxu1 %vm460_vm1, %v3905_v57  ;;  %3349 = vmatprep.mubr.msk.f32.mxu0 %vm460_vm1, %v3905_v57 }
  0x90   : > { %3236 = vmatmul.mubr.msk.f32.gmra.mrb[54].mxu1 %vm460_vm1, %v3911_v59  ;;  %3350 = vmatmul.mubr.msk.f32.gmra.mrb[54].mxu0 %vm460_vm1, %v3911_v59 }
  0x91   : > { %3240 = vmatprep.mubr.msk.f32.mxu1 %vm460_vm1, %v3721_v7  ;;  %3354 = vmatprep.mubr.msk.f32.mxu0 %vm460_vm1, %v3721_v7 }
  0x94   : > { %3241 = vmatmul.mubr.msk.f32.vlgmr.msra.gmra.mrb[32].mxu1 %vm460_vm1, %v3728_v12  ;;  %3355 = vmatmul.mubr.msk.f32.vlgmr.msra.gmra.mrb[32].mxu0 %vm460_vm1, %v3728_v12 }
  0x95   : > { %3277 = vmatpush3.msk.msra.mxu1 %vm533_vm0, %v2742_v3  ;;  %3391 = vmatpush3.msk.msra.mxu0 %vm533_vm0, %v2820_v4 }
  0x96   : > { %3243 = vmatprep.mubr.msk.f32.mxu1 %vm460_vm1, %v3732_v14  ;;  %3357 = vmatprep.mubr.msk.f32.mxu0 %vm460_vm1, %v3732_v14 }
  0x98   : > { %3244 = vmatmul.mubr.msk.f32.gmra.mrb[34].mxu1 %vm460_vm1, %v3719_v6  ;;  %3358 = vmatmul.mubr.msk.f32.gmra.mrb[34].mxu0 %vm460_vm1, %v3719_v6 }
  0x99   : > { %3246 = vmatprep.mubr.msk.f32.mxu1 %vm460_vm1, %v3723_v8  ;;  %3360 = vmatprep.mubr.msk.f32.mxu0 %vm460_vm1, %v3723_v8 }
  0x9c   : > { %3247 = vmatmul.mubr.msk.f32.gmra.mrb[36].mxu1 %vm460_vm1, %v3730_v13  ;;  %3361 = vmatmul.mubr.msk.f32.gmra.mrb[36].mxu0 %vm460_vm1, %v3730_v13 }
  0x9d   : > { %3249 = vmatprep.mubr.msk.f32.mxu1 %vm460_vm1, %v3744_v17  ;;  %3363 = vmatprep.mubr.msk.f32.mxu0 %vm460_vm1, %v3744_v17 }
  0xa0   : > { %3250 = vmatmul.mubr.msk.f32.gmra.mrb[38].mxu1 %vm460_vm1, %v3756_v20  ;;  %3364 = vmatmul.mubr.msk.f32.gmra.mrb[38].mxu0 %vm460_vm1, %v3756_v20 }
  0xa1   : > { %3252 = vmatprep.mubr.msk.f32.mxu1 %vm460_vm1, %v3771_v23  ;;  %3366 = vmatprep.mubr.msk.f32.mxu0 %vm460_vm1, %v3771_v23 }
  0xa4   : > { %3253 = vmatmul.mubr.msk.f32.gmra.mrb[40].mxu1 %vm460_vm1, %v3777_v24  ;;  %3367 = vmatmul.mubr.msk.f32.gmra.mrb[40].mxu0 %vm460_vm1, %v3777_v24 }
  0xa5   : > { %3255 = vmatprep.mubr.msk.f32.mxu1 %vm460_vm1, %v3785_v27  ;;  %3369 = vmatprep.mubr.msk.f32.mxu0 %vm460_vm1, %v3785_v27 }
  0xa8   : > { %3256 = vmatmul.mubr.msk.f32.gmra.mrb[42].mxu1 %vm460_vm1, %v3791_v28  ;;  %3370 = vmatmul.mubr.msk.f32.gmra.mrb[42].mxu0 %vm460_vm1, %v3791_v28 }
  0xa9   : > { %3258 = vmatprep.mubr.msk.f32.mxu1 %vm460_vm1, %v3802_v31  ;;  %3372 = vmatprep.mubr.msk.f32.mxu0 %vm460_vm1, %v3802_v31 }
  0xac   : > { %3259 = vmatmul.mubr.msk.f32.gmra.mrb[44].mxu1 %vm460_vm1, %v3809_v32  ;;  %3373 = vmatmul.mubr.msk.f32.gmra.mrb[44].mxu0 %vm460_vm1, %v3809_v32 }
  0xad   : > { %3261 = vmatprep.mubr.msk.f32.mxu1 %vm460_vm1, %v3817_v35  ;;  %3375 = vmatprep.mubr.msk.f32.mxu0 %vm460_vm1, %v3817_v35 }
  0xb0   : > { %3262 = vmatmul.mubr.msk.f32.gmra.mrb[46].mxu1 %vm460_vm1, %v3824_v36  ;;  %3376 = vmatmul.mubr.msk.f32.gmra.mrb[46].mxu0 %vm460_vm1, %v3824_v36 }
  0xb1   : > { %3264 = vmatprep.mubr.msk.f32.mxu1 %vm460_vm1, %v3832_v39  ;;  %3378 = vmatprep.mubr.msk.f32.mxu0 %vm460_vm1, %v3832_v39 }
  0xb4   : > { %3265 = vmatmul.mubr.msk.f32.gmra.mrb[48].mxu1 %vm460_vm1, %v3838_v40  ;;  %3379 = vmatmul.mubr.msk.f32.gmra.mrb[48].mxu0 %vm460_vm1, %v3838_v40 }
  0xb5   : > { %3267 = vmatprep.mubr.msk.f32.mxu1 %vm460_vm1, %v3851_v44  ;;  %3381 = vmatprep.mubr.msk.f32.mxu0 %vm460_vm1, %v3851_v44 }
  0xb8   : > { %3268 = vmatmul.mubr.msk.f32.gmra.mrb[50].mxu1 %vm460_vm1, %v3857_v45  ;;  %3382 = vmatmul.mubr.msk.f32.gmra.mrb[50].mxu0 %vm460_vm1, %v3857_v45 }
  0xb9   : > { %3270 = vmatprep.mubr.msk.f32.mxu1 %vm460_vm1, %v3869_v48  ;;  %3384 = vmatprep.mubr.msk.f32.mxu0 %vm460_vm1, %v3869_v48 }
  0xbc   : > { %3271 = vmatmul.mubr.msk.f32.gmra.mrb[52].mxu1 %vm460_vm1, %v3875_v49  ;;  %3385 = vmatmul.mubr.msk.f32.gmra.mrb[52].mxu0 %vm460_vm1, %v3875_v49 }
  0xbd   : > { %3273 = vmatprep.mubr.msk.f32.mxu1 %vm460_vm1, %v3886_v52  ;;  %3387 = vmatprep.mubr.msk.f32.mxu0 %vm460_vm1, %v3886_v52 }
  0xc0   : > { %3274 = vmatmul.mubr.msk.f32.gmra.mrb[54].mxu1 %vm460_vm1, %v3892_v53  ;;  %3388 = vmatmul.mubr.msk.f32.gmra.mrb[54].mxu0 %vm460_vm1, %v3892_v53 }
  0xc1   : > { %3278 = vmatprep.mubr.msk.f32.mxu1 %vm460_vm1, %v3744_v17  ;;  %3392 = vmatprep.mubr.msk.f32.mxu0 %vm460_vm1, %v3744_v17 }
  0xc4   : > { %3279 = vmatmul.mubr.msk.f32.vlgmr.msra.gmra.mrb[32].mxu1 %vm460_vm1, %v3756_v20  ;;  %3393 = vmatmul.mubr.msk.f32.vlgmr.msra.gmra.mrb[32].mxu0 %vm460_vm1, %v3756_v20 }
  0xc5   : > { %3281 = vmatprep.mubr.msk.f32.mxu1 %vm460_vm1, %v3771_v23  ;;  %3395 = vmatprep.mubr.msk.f32.mxu0 %vm460_vm1, %v3771_v23 }
  0xc8   : > { %3282 = vmatmul.mubr.msk.f32.gmra.mrb[34].mxu1 %vm460_vm1, %v3777_v24  ;;  %3396 = vmatmul.mubr.msk.f32.gmra.mrb[34].mxu0 %vm460_vm1, %v3777_v24 }
  0xc9   : > { %3284 = vmatprep.mubr.msk.f32.mxu1 %vm460_vm1, %v3785_v27  ;;  %3398 = vmatprep.mubr.msk.f32.mxu0 %vm460_vm1, %v3785_v27 }
  0xcc   : > { %3285 = vmatmul.mubr.msk.f32.gmra.mrb[36].mxu1 %vm460_vm1, %v3791_v28  ;;  %3399 = vmatmul.mubr.msk.f32.gmra.mrb[36].mxu0 %vm460_vm1, %v3791_v28 }
  0xcd   : > { %3287 = vmatprep.mubr.msk.f32.mxu1 %vm460_vm1, %v3802_v31  ;;  %3401 = vmatprep.mubr.msk.f32.mxu0 %vm460_vm1, %v3802_v31 }
  0xd0   : > { %3288 = vmatmul.mubr.msk.f32.gmra.mrb[38].mxu1 %vm460_vm1, %v3809_v32  ;;  %3402 = vmatmul.mubr.msk.f32.gmra.mrb[38].mxu0 %vm460_vm1, %v3809_v32 }
  0xd1   : > { %3290 = vmatprep.mubr.msk.f32.mxu1 %vm460_vm1, %v3817_v35  ;;  %3404 = vmatprep.mubr.msk.f32.mxu0 %vm460_vm1, %v3817_v35 }
  0xd4   : > { %3291 = vmatmul.mubr.msk.f32.gmra.mrb[40].mxu1 %vm460_vm1, %v3824_v36  ;;  %3405 = vmatmul.mubr.msk.f32.gmra.mrb[40].mxu0 %vm460_vm1, %v3824_v36 }
  0xd5   : > { %3293 = vmatprep.mubr.msk.f32.mxu1 %vm460_vm1, %v3832_v39  ;;  %3407 = vmatprep.mubr.msk.f32.mxu0 %vm460_vm1, %v3832_v39 }
  0xd8   : > { %3294 = vmatmul.mubr.msk.f32.gmra.mrb[42].mxu1 %vm460_vm1, %v3838_v40  ;;  %3408 = vmatmul.mubr.msk.f32.gmra.mrb[42].mxu0 %vm460_vm1, %v3838_v40 }
  0xd9   : > { %3296 = vmatprep.mubr.msk.f32.mxu1 %vm460_vm1, %v3851_v44  ;;  %3410 = vmatprep.mubr.msk.f32.mxu0 %vm460_vm1, %v3851_v44 }
  0xdc   : > { %3297 = vmatmul.mubr.msk.f32.gmra.mrb[44].mxu1 %vm460_vm1, %v3857_v45  ;;  %3411 = vmatmul.mubr.msk.f32.gmra.mrb[44].mxu0 %vm460_vm1, %v3857_v45 }
  0xdd   : > { %3299 = vmatprep.mubr.msk.f32.mxu1 %vm460_vm1, %v3869_v48  ;;  %3413 = vmatprep.mubr.msk.f32.mxu0 %vm460_vm1, %v3869_v48 }
  0xe0   : > { %3300 = vmatmul.mubr.msk.f32.gmra.mrb[46].mxu1 %vm460_vm1, %v3875_v49  ;;  %3414 = vmatmul.mubr.msk.f32.gmra.mrb[46].mxu0 %vm460_vm1, %v3875_v49 }
  0xe1   : > { %3302 = vmatprep.mubr.msk.f32.mxu1 %vm460_vm1, %v3886_v52  ;;  %3416 = vmatprep.mubr.msk.f32.mxu0 %vm460_vm1, %v3886_v52 }
  0xe4   : > { %3303 = vmatmul.mubr.msk.f32.gmra.mrb[48].mxu1 %vm460_vm1, %v3892_v53  ;;  %3417 = vmatmul.mubr.msk.f32.gmra.mrb[48].mxu0 %vm460_vm1, %v3892_v53 }
  0xe5   : > { %3305 = vmatprep.mubr.msk.f32.mxu1 %vm460_vm1, %v3899_v56  ;;  %3419 = vmatprep.mubr.msk.f32.mxu0 %vm460_vm1, %v3899_v56 }
  0xe8   : > { %3306 = vmatmul.mubr.msk.f32.gmra.mrb[50].mxu1 %vm460_vm1, %v3905_v57  ;;  %3420 = vmatmul.mubr.msk.f32.gmra.mrb[50].mxu0 %vm460_vm1, %v3905_v57 }
  0xe9   : > { %3308 = vmatprep.mubr.msk.f32.mxu1 %vm460_vm1, %v3911_v59  ;;  %3422 = vmatprep.mubr.msk.f32.mxu0 %vm460_vm1, %v3911_v59 }
  0xec   : > { %3309 = vmatmul.mubr.msk.f32.gmra.mrb[52].mxu1 %vm460_vm1, %v3963_v63  ;;  %3423 = vmatmul.mubr.msk.f32.gmra.mrb[52].mxu0 %vm460_vm1, %v3963_v63 }
  0xed   : > { %3311 = vmatprep.mubr.msk.f32.mxu1 %vm460_vm1, %v3969_v0  ;;  %3425 = vmatprep.mubr.msk.f32.mxu0 %vm460_vm1, %v3969_v0 }
  0xef   : > { %v3090_v5 = vpop.f32.mrb[0].mxu1 }
  0xf0   : > { %v603_v6 = vpop.f32.mrb[1].mxu1  ;;  %3312 = vmatmul.mubr.msk.f32.gmra.mrb[54].mxu1 %vm460_vm1, %v3975_v2  ;;  %3426 = vmatmul.mubr.msk.f32.gmra.mrb[54].mxu0 %vm460_vm1, %v3975_v2 }
  0xf3   : > { %v3093_v7 = vpop.f32.mrb[2].mxu1  ;;  %v3131_v8 = vpop.f32.mrb[2].mxu0 }
  0xf4   : > { %v807_v9 = vadd.f32 %v3131_v8, %v3093_v7  ;;  %v613_v10 = vpop.f32.mrb[3].mxu1  ;;  %v802_v11 = vpop.f32.mrb[3].mxu0 }
  0xf7   : > { %v3096_v12 = vpop.f32.mrb[4].mxu1  ;;  %v3134_v13 = vpop.f32.mrb[4].mxu0 }
  0xf8   : > { %v622_v14 = vpop.f32.mrb[5].mxu1  ;;  %v811_v15 = vpop.f32.mrb[5].mxu0 }
  0xf9   : > { %v812_v16 = vadd.f32 %v811_v15, %v622_v14 }
  0xfb   : > { %v3099_v17 = vpop.f32.mrb[6].mxu1 }
  0xfc   : > { %v631_v18 = vpop.f32.mrb[7].mxu1 }
  0xff   : > { %v3102_v19 = vpop.f32.mrb[8].mxu1  ;;  %v3140_v20 = vpop.f32.mrb[8].mxu0 }
 0x100   : > { %v835_v21 = vadd.f32 %v3140_v20, %v3102_v19  ;;  %v641_v22 = vpop.f32.mrb[9].mxu1  ;;  %v830_v23 = vpop.f32.mrb[9].mxu0 }
 0x103   : > { %v3105_v24 = vpop.f32.mrb[10].mxu1  ;;  %v3143_v25 = vpop.f32.mrb[10].mxu0 }
 0x104   : > { %v650_v26 = vpop.f32.mrb[11].mxu1  ;;  %v839_v27 = vpop.f32.mrb[11].mxu0 }
 0x105   : > { %v840_v28 = vadd.f32 %v839_v27, %v650_v26 }
 0x107   : > { %v3166_v29 = vpop.f32.mrb[0].mxu0 }
 0x108   : > { %v4286_v30 = vadd.f32 %v3166_v29, %v3090_v5  ;;  %v983_v31 = vpop.f32.mrb[1].mxu0  ;;  %v1728_v29 = vlaneseq }
 0x109   : > { %v4288_v32 = vadd.f32 %v983_v31, %v603_v6 }
 0x10a   : > { %v4320_v31 = vshrl.u32 %v1728_v29, 7 }
 0x10b   : > { %v3111_v33 = vpop.f32.mrb[14].mxu1  ;;  %v3169_v34 = vpop.f32.mrb[12].mxu0 }
 0x10c   : > { %v4290_v35 = vadd.f32 %v3169_v34, %v807_v9  ;;  %v669_v36 = vpop.f32.mrb[15].mxu1  ;;  %v993_v37 = vpop.f32.mrb[13].mxu0  ;;  %vm1730_vm2 = vcmp.lt.s32.totalorder %v4320_v31, 7  ;;  %vm2381_vm3 = vcmp.lt.s32.totalorder %v4320_v31, 6 }
 0x10f   : > { %v3114_v38 = vpop.f32.mrb[16].mxu1  ;;  %v3172_v39 = vpop.f32.mrb[14].mxu0 }
 0x110   : > { %v678_v40 = vpop.f32.mrb[17].mxu1  ;;  %v1002_v41 = vpop.f32.mrb[15].mxu0 }
 0x111   : > { %v4292_v42 = vadd.f32 %v1002_v41, %v812_v16 }
 0x113   : > { %v3175_v43 = vpop.f32.mrb[6].mxu0 }
 0x114   : > { %v4294_v44 = vadd.f32 %v3175_v43, %v3099_v17  ;;  %v1011_v45 = vpop.f32.mrb[7].mxu0 }
 0x115   : > { %v4296_v46 = vadd.f32 %v1011_v45, %v631_v18 }
 0x117   : > { %v3120_v47 = vpop.f32.mrb[20].mxu1  ;;  %v3178_v48 = vpop.f32.mrb[16].mxu0 }
 0x118   : > { %v4298_v49 = vadd.f32 %v3178_v48, %v835_v21  ;;  %v697_v50 = vpop.f32.mrb[21].mxu1  ;;  %v1021_v51 = vpop.f32.mrb[17].mxu0 }
 0x11b   : > { %v3123_v52 = vpop.f32.mrb[22].mxu1  ;;  %v3181_v53 = vpop.f32.mrb[18].mxu0 }
 0x11c   : > { %v706_v54 = vpop.f32.mrb[23].mxu1  ;;  %v1030_v55 = vpop.f32.mrb[19].mxu0  ;;  %v4333_v53 = vld [vmem:[%s4482_s4] ss:$0 sm:$0xff] }
 0x11d   : > { %v4300_v56 = vadd.f32 %v1030_v55, %v840_v28 }
 0x11f   : > { %v3146_v57 = vpop.f32.mrb[12].mxu1  ;;  %v3184_v58 = vpop.f32.mrb[20].mxu0 }
 0x120   : > { %v4302_v59 = vadd.f32 %v3184_v58, %v3146_v57  ;;  %v848_v60 = vpop.f32.mrb[13].mxu1  ;;  %v1039_v61 = vpop.f32.mrb[21].mxu0 }
 0x121   : > { %v4304_v62 = vadd.f32 %v1039_v61, %v848_v60 }
 0x123   : > { %v3149_v63 = vpop.f32.mrb[24].mxu1  ;;  %v3187_v0 = vpop.f32.mrb[22].mxu0 }
 0x124   : > { %v863_v1 = vadd.f32 %v3149_v63, %v3111_v33  ;;  %v858_v2 = vpop.f32.mrb[25].mxu1  ;;  %v1049_v3 = vpop.f32.mrb[23].mxu0 }
 0x126   : > { %v4306_v4 = vadd.f32 %v3187_v0, %v863_v1 }
 0x127   : > { %v3152_v5 = vpop.f32.mrb[26].mxu1  ;;  %v3190_v6 = vpop.f32.mrb[24].mxu0 }
 0x128   : > { %v867_v7 = vpop.f32.mrb[27].mxu1  ;;  %v1058_v8 = vpop.f32.mrb[25].mxu0 }
 0x129   : > { %v868_v9 = vadd.f32 %v867_v7, %v678_v40 }
 0x12b   : > { %v4308_v10 = vadd.f32 %v1058_v8, %v868_v9  ;;  %v3155_v11 = vpop.f32.mrb[18].mxu1  ;;  %v3193_v12 = vpop.f32.mrb[26].mxu0 }
 0x12c   : > { %v4310_v13 = vadd.f32 %v3193_v12, %v3155_v11  ;;  %v876_v14 = vpop.f32.mrb[19].mxu1  ;;  %v1067_v15 = vpop.f32.mrb[27].mxu0 }
 0x12d   : > { %v4312_v16 = vadd.f32 %v1067_v15, %v876_v14 }
 0x12f   : > { %v3158_v17 = vpop.f32.mrb[28].mxu1  ;;  %v3196_v18 = vpop.f32.mrb[28].mxu0 }
 0x130   : > { %v891_v19 = vadd.f32 %v3158_v17, %v3120_v47  ;;  %v886_v20 = vpop.f32.mrb[29].mxu1  ;;  %v1077_v21 = vpop.f32.mrb[29].mxu0 }
 0x132   : > { %v4314_v22 = vadd.f32 %v3196_v18, %v891_v19 }
 0x133   : > { %v3161_v23 = vpop.f32.mrb[30].mxu1  ;;  %v3199_v24 = vpop.f32.mrb[30].mxu0 }
 0x134   : > { %v895_v25 = vpop.f32.mrb[31].mxu1  ;;  %v1086_v26 = vpop.f32.mrb[31].mxu0 }
 0x135   : > { %v896_v27 = vadd.f32 %v895_v25, %v706_v54 }
 0x137   : > { %v4316_v28 = vadd.f32 %v1086_v26, %v896_v27 }
 0x197   : > { %v3280_v33 = vpop.f32.mrb[32].mxu1  ;;  %v3394_v34 = vpop.f32.mrb[32].mxu0 }
 0x198   : > { %v1712_v36 = vrot.slane %v3280_v33, 1  ;;  %v2365_v37 = vrot.slane %v3394_v34, 2  ;;  %v1561_v38 = vpop.f32.mrb[33].mxu1  ;;  %v2214_v39 = vpop.f32.mrb[33].mxu0 }
 0x199   : > { %v1704_v40 = vrot.slane %v1561_v38, 1  ;;  %v2357_v41 = vrot.slane %v2214_v39, 2 }
 0x19b   : > { %v1739_v43 = vsel %vm1730_vm2, %v1704_v40, %v1712_v36  ;;  %v2390_v45 = vsel %vm2381_vm3, %v2357_v41, %v2365_v37  ;;  %v3283_v47 = vpop.f32.mrb[34].mxu1  ;;  %v3397_v48 = vpop.f32.mrb[34].mxu0 }
 0x19c   : > { %v1747_v50 = vadd.f32 %v4288_v32, %v1739_v43  ;;  %v1571_v51 = vpop.f32.mrb[35].mxu1  ;;  %v2224_v52 = vpop.f32.mrb[35].mxu0  ;;  %v1705_v6 = vrot.slane %v3283_v47, 1  ;;  %v2358_v7 = vrot.slane %v3397_v48, 2 }
 0x19d   : > { %v1720_v54 = vrot.slane %v1571_v51, 1  ;;  %v2373_v55 = vrot.slane %v2224_v52, 2 }
 0x19e   : > { %v2398_v57 = vadd.f32 %v2390_v45, %v1747_v50 }
 0x19f   : > { %v1731_v32 = vsel %vm1730_vm2, %v1712_v36, %v1720_v54  ;;  %v2382_v58 = vsel %vm2381_vm3, %v2365_v37, %v2373_v55  ;;  %v3286_v60 = vpop.f32.mrb[36].mxu1  ;;  %v3400_v61 = vpop.f32.mrb[36].mxu0 }
 0x1a0   : > { %v2421_v63 = vadd.f32 %v4333_v53, %v2398_v57  ;;  %v1748_v0 = vadd.f32 %v4286_v30, %v1731_v32  ;;  %v1721_v1 = vrot.slane %v3286_v60, 1  ;;  %v2374_v2 = vrot.slane %v3400_v61, 2  ;;  %v1581_v3 = vpop.f32.mrb[37].mxu1  ;;  %v2234_v5 = vpop.f32.mrb[37].mxu0 }
 0x1a1   : > { %v1713_v8 = vrot.slane %v1581_v3, 1  ;;  %v2366_v9 = vrot.slane %v2234_v5, 2 }
 0x1a2   : > { %2437 = vst.msk [vmem:[%s4338_s13] sm:$0xff] %vm460_vm1, %v2421_v63  ;;  %v2399_v11 = vadd.f32 %v2382_v58, %v1748_v0 }
 0x1a3   : > { %v1732_v12 = vsel %vm1730_vm2, %v1713_v8, %v1721_v1  ;;  %v1740_v14 = vsel %vm1730_vm2, %v1705_v6, %v1713_v8  ;;  %v2383_v30 = vsel %vm2381_vm3, %v2366_v9, %v2374_v2  ;;  %v2391_v15 = vsel %vm2381_vm3, %v2358_v7, %v2366_v9  ;;  %v3289_v17 = vpop.f32.mrb[38].mxu1  ;;  %v3403_v18 = vpop.f32.mrb[38].mxu0 }
 0x1a4   : > { %v2422_v19 = vadd.f32 %v4333_v53, %v2399_v11  ;;  %v1749_v20 = vadd.f32 %v1740_v14, %v4290_v35  ;;  %v1750_v21 = vadd.f32 %v1732_v12, %v4292_v42  ;;  %v1714_v23 = vrot.slane %v3289_v17, 1  ;;  %v1591_v24 = vpop.f32.mrb[39].mxu1  ;;  %v2244_v25 = vpop.f32.mrb[39].mxu0 }
 0x1a5   : > { %v2367_v26 = vrot.slane %v3403_v18, 2  ;;  %v1706_v27 = vrot.slane %v1591_v24, 1  ;;  %v2359_v29 = vrot.slane %v2244_v25, 2 }
 0x1a6   : > { %2438 = vst.msk [vmem:[%s4338_s13 + $0x8] sm:$0xff] %vm460_vm1, %v2422_v19  ;;  %v2400_v33 = vadd.f32 %v2391_v15, %v1749_v20  ;;  %v2401_v34 = vadd.f32 %v2383_v30, %v1750_v21 }
 0x1a7   : > { %v1741_v36 = vsel %vm1730_vm2, %v1706_v27, %v1714_v23  ;;  %v2392_v35 = vsel %vm2381_vm3, %v2359_v29, %v2367_v26  ;;  %v3292_v37 = vpop.f32.mrb[40].mxu1  ;;  %v3406_v42 = vpop.f32.mrb[40].mxu0 }
 0x1a8   : > { %v2423_v38 = vadd.f32 %v4333_v53, %v2400_v33  ;;  %v2424_v39 = vadd.f32 %v4333_v53, %v2401_v34  ;;  %v1751_v40 = vadd.f32 %v4296_v46, %v1741_v36  ;;  %v1601_v41 = vpop.f32.mrb[41].mxu1  ;;  %v2254_v43 = vpop.f32.mrb[41].mxu0  ;;  %v1707_v61 = vrot.slane %v3292_v37, 1 }
 0x1a9   : > { %v1722_v45 = vrot.slane %v1601_v41, 1  ;;  %v2375_v47 = vrot.slane %v2254_v43, 2  ;;  %v2360_v63 = vrot.slane %v3406_v42, 2 }
 0x1aa   : > { %2439 = vst.msk [vmem:[%s4338_s13 + $0x10] sm:$0xff] %vm460_vm1, %v2423_v38  ;;  %2440 = vst.msk [vmem:[%s4338_s13 + $0x18] sm:$0xff] %vm460_vm1, %v2424_v39  ;;  %v2402_v48 = vadd.f32 %v2392_v35, %v1751_v40 }
 0x1ab   : > { %v1733_v50 = vsel %vm1730_vm2, %v1714_v23, %v1722_v45  ;;  %v2384_v51 = vsel %vm2381_vm3, %v2367_v26, %v2375_v47  ;;  %v3295_v52 = vpop.f32.mrb[42].mxu1  ;;  %v3409_v54 = vpop.f32.mrb[42].mxu0 }
 0x1ac   : > { %v2425_v46 = vadd.f32 %v4333_v53, %v2402_v48  ;;  %v1752_v55 = vadd.f32 %v4294_v44, %v1733_v50  ;;  %v1723_v57 = vrot.slane %v3295_v52, 1  ;;  %v2376_v32 = vrot.slane %v3409_v54, 2  ;;  %v1611_v58 = vpop.f32.mrb[43].mxu1  ;;  %v2264_v60 = vpop.f32.mrb[43].mxu0 }
 0x1ad   : > { %v1715_v0 = vrot.slane %v1611_v58, 1  ;;  %v2368_v1 = vrot.slane %v2264_v60, 2 }
 0x1ae   : > { %2441 = vst.msk [vmem:[%s4338_s13 + $0x20] sm:$0xff] %vm460_vm1, %v2425_v46  ;;  %v2403_v2 = vadd.f32 %v2384_v51, %v1752_v55 }
 0x1af   : > { %v1734_v3 = vsel %vm1730_vm2, %v1715_v0, %v1723_v57  ;;  %v1742_v5 = vsel %vm1730_vm2, %v1707_v61, %v1715_v0  ;;  %v2385_v44 = vsel %vm2381_vm3, %v2368_v1, %v2376_v32  ;;  %v2393_v6 = vsel %vm2381_vm3, %v2360_v63, %v2368_v1  ;;  %v3298_v7 = vpop.f32.mrb[44].mxu1  ;;  %v3412_v8 = vpop.f32.mrb[44].mxu0 }
 0x1b0   : > { %v2426_v9 = vadd.f32 %v4333_v53, %v2403_v2  ;;  %v1753_v11 = vadd.f32 %v1742_v5, %v4298_v49  ;;  %v1754_v12 = vadd.f32 %v1734_v3, %v4300_v56  ;;  %v1716_v14 = vrot.slane %v3298_v7, 1  ;;  %v1621_v30 = vpop.f32.mrb[45].mxu1  ;;  %v2274_v15 = vpop.f32.mrb[45].mxu0 }
 0x1b1   : > { %v2369_v17 = vrot.slane %v3412_v8, 2  ;;  %v1708_v18 = vrot.slane %v1621_v30, 1  ;;  %v2361_v19 = vrot.slane %v2274_v15, 2 }
 0x1b2   : > { %2442 = vst.msk [vmem:[%s4338_s13 + $0x28] sm:$0xff] %vm460_vm1, %v2426_v9  ;;  %v2404_v20 = vadd.f32 %v2393_v6, %v1753_v11  ;;  %v2405_v21 = vadd.f32 %v2385_v44, %v1754_v12 }
 0x1b3   : > { %v1743_v23 = vsel %vm1730_vm2, %v1708_v18, %v1716_v14  ;;  %v2394_v49 = vsel %vm2381_vm3, %v2361_v19, %v2369_v17  ;;  %v3301_v24 = vpop.f32.mrb[46].mxu1  ;;  %v3415_v56 = vpop.f32.mrb[46].mxu0 }
 0x1b4   : > { %v2427_v25 = vadd.f32 %v4333_v53, %v2404_v20  ;;  %v2428_v26 = vadd.f32 %v4333_v53, %v2405_v21  ;;  %v1755_v27 = vadd.f32 %v4304_v62, %v1743_v23  ;;  %v1631_v29 = vpop.f32.mrb[47].mxu1  ;;  %v2284_v33 = vpop.f32.mrb[47].mxu0  ;;  %v1709_v48 = vrot.slane %v3301_v24, 1 }
 0x1b5   : > { %v1724_v34 = vrot.slane %v1631_v29, 1  ;;  %v2377_v36 = vrot.slane %v2284_v33, 2  ;;  %v2362_v50 = vrot.slane %v3415_v56, 2 }
 0x1b6   : > { %2443 = vst.msk [vmem:[%s4338_s13 + $0x30] sm:$0xff] %vm460_vm1, %v2427_v25  ;;  %2444 = vst.msk [vmem:[%s4338_s13 + $0x38] sm:$0xff] %vm460_vm1, %v2428_v26  ;;  %v2406_v35 = vadd.f32 %v2394_v49, %v1755_v27 }
 0x1b7   : > { %v1735_v37 = vsel %vm1730_vm2, %v1716_v14, %v1724_v34  ;;  %v2386_v42 = vsel %vm2381_vm3, %v2369_v17, %v2377_v36  ;;  %v3304_v38 = vpop.f32.mrb[48].mxu1  ;;  %v3418_v39 = vpop.f32.mrb[48].mxu0 }
 0x1b8   : > { %v2429_v62 = vadd.f32 %v4333_v53, %v2406_v35  ;;  %v1756_v40 = vadd.f32 %v4302_v59, %v1735_v37  ;;  %v1725_v41 = vrot.slane %v3304_v38, 1  ;;  %v2378_v43 = vrot.slane %v3418_v39, 2  ;;  %v1641_v45 = vpop.f32.mrb[49].mxu1  ;;  %v2294_v47 = vpop.f32.mrb[49].mxu0 }
 0x1b9   : > { %v1717_v51 = vrot.slane %v1641_v45, 1  ;;  %v2370_v52 = vrot.slane %v2294_v47, 2 }
 0x1ba   : > { %2445 = vst.msk [vmem:[%s4338_s13 + $0x40] sm:$0xff] %vm460_vm1, %v2429_v62  ;;  %v2407_v54 = vadd.f32 %v2386_v42, %v1756_v40 }
 0x1bb   : > { %v1736_v46 = vsel %vm1730_vm2, %v1717_v51, %v1725_v41  ;;  %v1744_v55 = vsel %vm1730_vm2, %v1709_v48, %v1717_v51  ;;  %v2387_v59 = vsel %vm2381_vm3, %v2370_v52, %v2378_v43  ;;  %v2395_v57 = vsel %vm2381_vm3, %v2362_v50, %v2370_v52  ;;  %v3307_v32 = vpop.f32.mrb[50].mxu1  ;;  %v3421_v58 = vpop.f32.mrb[50].mxu0 }
 0x1bc   : > { %v2430_v60 = vadd.f32 %v4333_v53, %v2407_v54  ;;  %v1757_v61 = vadd.f32 %v1744_v55, %v4306_v4  ;;  %v1758_v63 = vadd.f32 %v1736_v46, %v4308_v10  ;;  %v1718_v0 = vrot.slane %v3307_v32, 1  ;;  %v1651_v1 = vpop.f32.mrb[51].mxu1  ;;  %v2304_v2 = vpop.f32.mrb[51].mxu0 }
 0x1bd   : > { %v2371_v3 = vrot.slane %v3421_v58, 2  ;;  %v1710_v5 = vrot.slane %v1651_v1, 1  ;;  %v2363_v44 = vrot.slane %v2304_v2, 2 }
 0x1be   : > { %2446 = vst.msk [vmem:[%s4338_s13 + $0x48] sm:$0xff] %vm460_vm1, %v2430_v60  ;;  %v2408_v6 = vadd.f32 %v2395_v57, %v1757_v61  ;;  %v2409_v7 = vadd.f32 %v2387_v59, %v1758_v63 }
 0x1bf   : > { %v1745_v8 = vsel %vm1730_vm2, %v1710_v5, %v1718_v0  ;;  %v2396_v4 = vsel %vm2381_vm3, %v2363_v44, %v2371_v3  ;;  %v3310_v9 = vpop.f32.mrb[52].mxu1  ;;  %v3424_v10 = vpop.f32.mrb[52].mxu0 }
 0x1c0   : > { %v2431_v11 = vadd.f32 %v4333_v53, %v2408_v6  ;;  %v2432_v12 = vadd.f32 %v4333_v53, %v2409_v7  ;;  %v1759_v14 = vadd.f32 %v4312_v16, %v1745_v8  ;;  %v1661_v30 = vpop.f32.mrb[53].mxu1  ;;  %v2314_v15 = vpop.f32.mrb[53].mxu0  ;;  %v1711_v29 = vrot.slane %v3310_v9, 1 }
 0x1c1   : > { %v1726_v17 = vrot.slane %v1661_v30, 1  ;;  %v2379_v18 = vrot.slane %v2314_v15, 2  ;;  %v2364_v33 = vrot.slane %v3424_v10, 2 }
 0x1c2   : > { %2447 = vst.msk [vmem:[%s4338_s13 + $0x50] sm:$0xff] %vm460_vm1, %v2431_v11  ;;  %2448 = vst.msk [vmem:[%s4338_s13 + $0x58] sm:$0xff] %vm460_vm1, %v2432_v12  ;;  %v2410_v19 = vadd.f32 %v2396_v4, %v1759_v14 }
 0x1c3   : > { %v1737_v20 = vsel %vm1730_vm2, %v1718_v0, %v1726_v17  ;;  %v2388_v21 = vsel %vm2381_vm3, %v2371_v3, %v2379_v18  ;;  %v3313_v23 = vpop.f32.mrb[54].mxu1  ;;  %v3427_v49 = vpop.f32.mrb[54].mxu0 }
 0x1c4   : > { %v2433_v16 = vadd.f32 %v4333_v53, %v2410_v19  ;;  %v1760_v24 = vadd.f32 %v4310_v13, %v1737_v20  ;;  %v1727_v56 = vrot.slane %v3313_v23, 1  ;;  %v2380_v25 = vrot.slane %v3427_v49, 2  ;;  %v1671_v26 = vpop.f32.mrb[55].mxu1  ;;  %v2324_v27 = vpop.f32.mrb[55].mxu0 }
 0x1c5   : > { %v1719_v34 = vrot.slane %v1671_v26, 1  ;;  %v2372_v36 = vrot.slane %v2324_v27, 2 }
 0x1c6   : > { %2449 = vst.msk [vmem:[%s4338_s13 + $0x60] sm:$0xff] %vm460_vm1, %v2433_v16  ;;  %v2411_v35 = vadd.f32 %v2388_v21, %v1760_v24 }
 0x1c7   : > { %v1738_v37 = vsel %vm1730_vm2, %v1719_v34, %v1727_v56  ;;  %v1746_v13 = vsel %vm1730_vm2, %v1711_v29, %v1719_v34  ;;  %v2389_v42 = vsel %vm2381_vm3, %v2372_v36, %v2380_v25  ;;  %v2397_v38 = vsel %vm2381_vm3, %v2364_v33, %v2372_v36 }
 0x1c8   : > { %v2434_v39 = vadd.f32 %v4333_v53, %v2411_v35  ;;  %v1761_v62 = vadd.f32 %v1746_v13, %v4314_v22  ;;  %v1762_v40 = vadd.f32 %v1738_v37, %v4316_v28 }
 0x1ca   : > { %2450 = vst.msk [vmem:[%s4338_s13 + $0x68] sm:$0xff] %vm460_vm1, %v2434_v39  ;;  %v2412_v41 = vadd.f32 %v2397_v38, %v1761_v62  ;;  %v2413_v43 = vadd.f32 %v2389_v42, %v1762_v40 }
 0x1cc   : > { %v2435_v45 = vadd.f32 %v4333_v53, %v2412_v41  ;;  %v2436_v47 = vadd.f32 %v4333_v53, %v2413_v43 }
 0x1ce   : > { %2451 = vst.msk [vmem:[%s4338_s13 + $0x70] sm:$0xff] %vm460_vm1, %v2435_v45  ;;  %2452 = vst.msk [vmem:[%s4338_s13 + $0x78] sm:$0xff] %vm460_vm1, %v2436_v47 }
 0x1cf PF: > { %s15_s22 = sadd.s32 1, %s3624_s22   ;;  %s4484_s18 = smov %s3616_s20 }
 0x1d0   : > { %p12_p10 = scmp.ge.s32.totalorder %s15_s22, 6   ;;  %s4485_s19 = smov %s3620_s21 }
 0x1d1   : > { %s4486_s20 = smov %s4489_s23  ;;  %s4487_s21 = smov %s4493_s24 }
 0x1d2   :  { %14 = sbr.rel (!%p12_p10) target bundleno = 3 (0x3), region = 84 }

</bundles_post_ra>
